<compile_context>
chip_gen: v6e
topology: v6e:2x2x1
jax: 0.10.0
libtpu: 0.0.40
codegen_flags: <defaults>
</compile_context>

<pallas_src>
import math

import jax
import jax.numpy as jnp
from jax.experimental import pallas as pl
from jax.experimental.pallas import tpu as pltpu


def _linear_columns_kernel(x_ref, w_ref, b_ref, o_ref):
    # x_ref: (TB, x1, x2)   w_ref: (x1, x2, out_dim)   b_ref: (x1, out_dim)
    # o_ref: (TB, x1 * out_dim)
    x1, _, out_dim = w_ref.shape
    for i in range(x1):  # static unroll: x1 is a small compile-time constant
        y = jnp.dot(x_ref[:, i, :], w_ref[i],
                    preferred_element_type=jnp.float32)
        y = y + b_ref[i:i + 1, :]                       # (1, out_dim) broadcast
        o_ref[:, i * out_dim:(i + 1) * out_dim] = y.astype(o_ref.dtype)


def _choose_batch_tile(B, x1, x2, out_dim, budget_bytes=8 * 1024 * 1024):
    """Largest batch tile whose double-buffered x/out blocks fit the budget."""
    bytes_per_row = 2 * 4 * x1 * (x2 + out_dim)   # 2 pipeline buffers, f32 rows
    tb = max(8, budget_bytes // max(bytes_per_row, 1))
    tb = min(tb, 1024)
    tb = (tb // 8) * 8                            # sublane-aligned tile
    if B <= tb:
        return B                                  # full extent is always legal
    return tb


def linear_columns_forward(x, weight, bias):
    """x: (batch..., x1, x2); weight: (x1, x2, out_dim); bias: (x1, out_dim)."""
    *batch_dims, x1, x2 = x.shape
    assert weight.shape[0] == x1 and weight.shape[1] == x2, "Input dimension mismatch"
    out_dim = weight.shape[2]
    B = math.prod(batch_dims) if batch_dims else 1

    x3 = x.reshape(B, x1, x2)                     # free: flattens leading dims only
    tb = _choose_batch_tile(B, x1, x2, out_dim)
    grid = (pl.cdiv(B, tb),)

    flops = 2 * B * x1 * x2 * out_dim + B * x1 * out_dim
    bytes_accessed = 4 * (B * x1 * x2 + x1 * x2 * out_dim + x1 * out_dim
                          + B * x1 * out_dim)

    out_flat = pl.pallas_call(
        _linear_columns_kernel,
        out_shape=jax.ShapeDtypeStruct((B, x1 * out_dim), x.dtype),
        grid_spec=pl.GridSpec(
            grid=grid,
            in_specs=[
                # Activation tile: last two dims are full extents -> layout-legal.
                pl.BlockSpec((tb, x1, x2), lambda b: (b, 0, 0)),
                # Whole weight, constant index_map -> fetched once, stays resident.
                pl.BlockSpec((x1, x2, out_dim), lambda b: (0, 0, 0)),
                # Whole bias, resident.
                pl.BlockSpec((x1, out_dim), lambda b: (0, 0)),
            ],
            out_specs=pl.BlockSpec((tb, x1 * out_dim), lambda b: (b, 0)),
        ),
        compiler_params=pltpu.CompilerParams(
            # Batch tiles are independent -> shard across TensorCores on v7x.
            dimension_semantics=("parallel",)),
        cost_estimate=pl.CostEstimate(
            flops=flops, transcendentals=0, bytes_accessed=bytes_accessed),
    )(x3, weight, bias)

    # Free view-reshape: (B, x1*out_dim) -> (batch..., x1, out_dim)
    return out_flat.reshape(*batch_dims, x1, out_dim)


if __name__ == "__main__":
    key = jax.random.PRNGKey(0)
    kx, kw, kb = jax.random.split(key, 3)

    batch_dims, x1_dim, x2_dim, out_dim = (2, 3), 4, 16, 8

    x = jax.random.normal(kx, (*batch_dims, x1_dim, x2_dim), dtype=jnp.float32)
    # PyTorch module initializes with torch.randn for both weight and bias.
    weight = jax.random.normal(kw, (x1_dim, x2_dim, out_dim), dtype=jnp.float32)
    bias = jax.random.normal(kb, (x1_dim, out_dim), dtype=jnp.float32)

    out = jax.block_until_ready(linear_columns_forward(x, weight, bias))

    # Pure-JAX reference of the PyTorch forward:
    # out[..., i, o] = sum_j x[..., i, j] * W[i, j, o] + bias[i, o]
    ref = jnp.einsum("...ij,ijo->...io", x, weight) + bias
    assert out.shape == ref.shape, (out.shape, ref.shape)
    assert jnp.allclose(out, ref, atol=1e-5, rtol=1e-5), (out, ref)

    print("KERNEL_OK")
</pallas_src>

<mosaic_0001>
module attributes {stable_mosaic.version = 11 : i64} {
  func.func @_linear_columns_kernel(%arg0: i32, %arg1: memref<6x4x16xf32, #tpu.memory_space<vmem>>, %arg2: memref<4x16x8xf32, #tpu.memory_space<vmem>>, %arg3: memref<4x8xf32, #tpu.memory_space<vmem>>, %arg4: memref<6x32xf32, #tpu.memory_space<vmem>>) attributes {dimension_semantics = [#tpu.dimension_semantics<parallel>], iteration_bounds = array<i64: 1>, scalar_prefetch = 0 : i64, scratch_operands = 0 : i64, tpu.core_type = #tpu.core_type<tc>, window_params = [{transform_indices = @transform_0, window_bounds = array<i64: 6, 4, 16>}, {pipeline_mode = #tpu.pipeline_mode<synchronous>, transform_indices = @transform_1, window_bounds = array<i64: 4, 16, 8>}, {pipeline_mode = #tpu.pipeline_mode<synchronous>, transform_indices = @transform_2, window_bounds = array<i64: 4, 8>}, {transform_indices = @transform_3, window_bounds = array<i64: 6, 32>}]} {
    %c0 = arith.constant 0 : index
    %c0_0 = arith.constant 0 : index
    %c0_1 = arith.constant 0 : index
    %0 = vector.load %arg1[%c0, %c0_0, %c0_1] : memref<6x4x16xf32, #tpu.memory_space<vmem>>, vector<6x1x16xf32>
    %1 = vector.shape_cast %0 : vector<6x1x16xf32> to vector<6x16xf32>
    %c0_2 = arith.constant 0 : index
    %c0_3 = arith.constant 0 : index
    %c0_4 = arith.constant 0 : index
    %2 = vector.load %arg2[%c0_2, %c0_3, %c0_4] : memref<4x16x8xf32, #tpu.memory_space<vmem>>, vector<1x16x8xf32>
    %3 = vector.shape_cast %2 : vector<1x16x8xf32> to vector<16x8xf32>
    %cst = arith.constant dense<0.000000e+00> : vector<6x8xf32>
    %4 = tpu.matmul %1, %3, %cst {dimension_numbers = #tpu.dot_dimension_numbers<[1], [0], [0], [1], [0, 0, 1, 1], [], []>} : vector<6x16xf32>, vector<16x8xf32>, vector<6x8xf32> -> vector<6x8xf32>
    %c0_5 = arith.constant 0 : index
    %c0_6 = arith.constant 0 : index
    %5 = vector.load %arg3[%c0_5, %c0_6] : memref<4x8xf32, #tpu.memory_space<vmem>>, vector<1x8xf32>
    %6 = vector.broadcast %5 : vector<1x8xf32> to vector<6x8xf32>
    %7 = arith.addf %4, %6 : vector<6x8xf32>
    %c0_7 = arith.constant 0 : index
    %c0_8 = arith.constant 0 : index
    %8 = vector.load %arg4[%c0_7, %c0_8] : memref<6x32xf32, #tpu.memory_space<vmem>>, vector<6x8xf32>
    tpu.vector_store %arg4[%c0_7, %c0_8], %7 {strides = array<i32>} : memref<6x32xf32, #tpu.memory_space<vmem>>, vector<6x8xf32>,
    %c0_9 = arith.constant 0 : index
    %c1 = arith.constant 1 : index
    %c0_10 = arith.constant 0 : index
    %9 = vector.load %arg1[%c0_9, %c1, %c0_10] : memref<6x4x16xf32, #tpu.memory_space<vmem>>, vector<6x1x16xf32>
    %10 = vector.shape_cast %9 : vector<6x1x16xf32> to vector<6x16xf32>
    %c1_11 = arith.constant 1 : index
    %c0_12 = arith.constant 0 : index
    %c0_13 = arith.constant 0 : index
    %11 = vector.load %arg2[%c1_11, %c0_12, %c0_13] : memref<4x16x8xf32, #tpu.memory_space<vmem>>, vector<1x16x8xf32>
    %12 = vector.shape_cast %11 : vector<1x16x8xf32> to vector<16x8xf32>
    %cst_14 = arith.constant dense<0.000000e+00> : vector<6x8xf32>
    %13 = tpu.matmul %10, %12, %cst_14 {dimension_numbers = #tpu.dot_dimension_numbers<[1], [0], [0], [1], [0, 0, 1, 1], [], []>} : vector<6x16xf32>, vector<16x8xf32>, vector<6x8xf32> -> vector<6x8xf32>
    %c1_15 = arith.constant 1 : index
    %c0_16 = arith.constant 0 : index
    %14 = vector.load %arg3[%c1_15, %c0_16] : memref<4x8xf32, #tpu.memory_space<vmem>>, vector<1x8xf32>
    %15 = vector.broadcast %14 : vector<1x8xf32> to vector<6x8xf32>
    %16 = arith.addf %13, %15 : vector<6x8xf32>
    %c0_17 = arith.constant 0 : index
    %c8 = arith.constant 8 : index
    %17 = vector.load %arg4[%c0_17, %c8] : memref<6x32xf32, #tpu.memory_space<vmem>>, vector<6x8xf32>
    tpu.vector_store %arg4[%c0_17, %c8], %16 {strides = array<i32>} : memref<6x32xf32, #tpu.memory_space<vmem>>, vector<6x8xf32>,
    %c0_18 = arith.constant 0 : index
    %c2 = arith.constant 2 : index
    %c0_19 = arith.constant 0 : index
    %18 = vector.load %arg1[%c0_18, %c2, %c0_19] : memref<6x4x16xf32, #tpu.memory_space<vmem>>, vector<6x1x16xf32>
    %19 = vector.shape_cast %18 : vector<6x1x16xf32> to vector<6x16xf32>
    %c2_20 = arith.constant 2 : index
    %c0_21 = arith.constant 0 : index
    %c0_22 = arith.constant 0 : index
    %20 = vector.load %arg2[%c2_20, %c0_21, %c0_22] : memref<4x16x8xf32, #tpu.memory_space<vmem>>, vector<1x16x8xf32>
    %21 = vector.shape_cast %20 : vector<1x16x8xf32> to vector<16x8xf32>
    %cst_23 = arith.constant dense<0.000000e+00> : vector<6x8xf32>
    %22 = tpu.matmul %19, %21, %cst_23 {dimension_numbers = #tpu.dot_dimension_numbers<[1], [0], [0], [1], [0, 0, 1, 1], [], []>} : vector<6x16xf32>, vector<16x8xf32>, vector<6x8xf32> -> vector<6x8xf32>
    %c2_24 = arith.constant 2 : index
    %c0_25 = arith.constant 0 : index
    %23 = vector.load %arg3[%c2_24, %c0_25] : memref<4x8xf32, #tpu.memory_space<vmem>>, vector<1x8xf32>
    %24 = vector.broadcast %23 : vector<1x8xf32> to vector<6x8xf32>
    %25 = arith.addf %22, %24 : vector<6x8xf32>
    %c0_26 = arith.constant 0 : index
    %c16 = arith.constant 16 : index
    %26 = vector.load %arg4[%c0_26, %c16] : memref<6x32xf32, #tpu.memory_space<vmem>>, vector<6x8xf32>
    tpu.vector_store %arg4[%c0_26, %c16], %25 {strides = array<i32>} : memref<6x32xf32, #tpu.memory_space<vmem>>, vector<6x8xf32>,
    %c0_27 = arith.constant 0 : index
    %c3 = arith.constant 3 : index
    %c0_28 = arith.constant 0 : index
    %27 = vector.load %arg1[%c0_27, %c3, %c0_28] : memref<6x4x16xf32, #tpu.memory_space<vmem>>, vector<6x1x16xf32>
    %28 = vector.shape_cast %27 : vector<6x1x16xf32> to vector<6x16xf32>
    %c3_29 = arith.constant 3 : index
    %c0_30 = arith.constant 0 : index
    %c0_31 = arith.constant 0 : index
    %29 = vector.load %arg2[%c3_29, %c0_30, %c0_31] : memref<4x16x8xf32, #tpu.memory_space<vmem>>, vector<1x16x8xf32>
    %30 = vector.shape_cast %29 : vector<1x16x8xf32> to vector<16x8xf32>
    %cst_32 = arith.constant dense<0.000000e+00> : vector<6x8xf32>
    %31 = tpu.matmul %28, %30, %cst_32 {dimension_numbers = #tpu.dot_dimension_numbers<[1], [0], [0], [1], [0, 0, 1, 1], [], []>} : vector<6x16xf32>, vector<16x8xf32>, vector<6x8xf32> -> vector<6x8xf32>
    %c3_33 = arith.constant 3 : index
    %c0_34 = arith.constant 0 : index
    %32 = vector.load %arg3[%c3_33, %c0_34] : memref<4x8xf32, #tpu.memory_space<vmem>>, vector<1x8xf32>
    %33 = vector.broadcast %32 : vector<1x8xf32> to vector<6x8xf32>
    %34 = arith.addf %31, %33 : vector<6x8xf32>
    %c0_35 = arith.constant 0 : index
    %c24 = arith.constant 24 : index
    %35 = vector.load %arg4[%c0_35, %c24] : memref<6x32xf32, #tpu.memory_space<vmem>>, vector<6x8xf32>
    tpu.vector_store %arg4[%c0_35, %c24], %34 {strides = array<i32>} : memref<6x32xf32, #tpu.memory_space<vmem>>, vector<6x8xf32>,
    return
  }
  func.func @transform_0(%arg0: i32) -> (i32, i32, i32) {
    %c0_i32 = arith.constant 0 : i32
    %c0_i32_0 = arith.constant 0 : i32
    %c0_i32_1 = arith.constant 0 : i32
    return %arg0, %c0_i32, %c0_i32_0 : i32, i32, i32
  }
  func.func @transform_1(%arg0: i32) -> (i32, i32, i32) {
    %c0_i32 = arith.constant 0 : i32
    %c0_i32_0 = arith.constant 0 : i32
    %c0_i32_1 = arith.constant 0 : i32
    %c0_i32_2 = arith.constant 0 : i32
    return %c0_i32, %c0_i32_0, %c0_i32_1 : i32, i32, i32
  }
  func.func @transform_2(%arg0: i32) -> (i32, i32) {
    %c0_i32 = arith.constant 0 : i32
    %c0_i32_0 = arith.constant 0 : i32
    %c0_i32_1 = arith.constant 0 : i32
    return %c0_i32, %c0_i32_0 : i32, i32
  }
  func.func @transform_3(%arg0: i32) -> (i32, i32) {
    %c0_i32 = arith.constant 0 : i32
    %c0_i32_0 = arith.constant 0 : i32
    return %arg0, %c0_i32 : i32, i32
  }
}

</mosaic_0001>

<bundles_post_ra>
// kernel: tpu_custom_call.1
= control target key start
LH: loop header
LB: loop body
LE: loop exit
PB: predicated region body
PF: predicated region fallthrough
CT: control target
= control target key end

     0   :  { %v544_v3 = vmov 0.0   ;;  %vm35_vm0 = vcmask 1041409   ;;  %vm38_vm1 = vcmask 1042434   ;;  %vm545_vm2 = vmmov 0   ;;  %s721_s0 = inlined_call_operand.vmem [shape: f32[6,4,16], index: 0, kind: input, shape index: {}]   ;;  %s722_s1 = inlined_call_operand.vmem [shape: f32[4,16,8], index: 1, kind: input, shape index: {}]   ;;  %s723_s2 = inlined_call_operand.vmem [shape: f32[4,8], index: 2, kind: input, shape index: {}]   ;;  %s724_s3 = inlined_call_operand.hbm [shape: f32[6,32], index: 3, kind: output, shape index: {}]  }
   0x1   :  { %v22_v0 = vld [vmem:[%s722_s1 + $0x8] sm:$0xff]  ;;  %v465_v1 = vld [vmem:[%s722_s1 + $0x18] sm:$0xff]  ;;  %v21_v2 = vld [vmem:[%s722_s1] sm:$0xff]  ;;  %488 = vmatprep.subr.mxu0 %v544_v3  ;;  %495 = vmatprep.subr.mxu1 %v544_v3  ;;  %vm41_vm3 = vcmask 1043459   ;;  %vm44_vm4 = vcmask 1044484   ;;  %vm47_vm5 = vcmask 1045509  }
   0x2   :  { %v464_v4 = vld [vmem:[%s722_s1 + $0x10] sm:$0xff]  ;;  %v15_v5 = vld [vmem:[%s721_s0] sm:$0x1]  ;;  %v16_v6 = vld [vmem:[%s721_s0 + $0x4] sm:$0x1]  ;;  %489 = vmatpush3.msra.mxu0 %v22_v0  ;;  %496 = vmatpush3.msra.mxu1 %v465_v1  ;;  %vm49_vm6 = vcmask 130048  }
   0x3   :  { %v17_v7 = vld [vmem:[%s721_s0 + $0x8] sm:$0x1]  ;;  %v18_v8 = vld [vmem:[%s721_s0 + $0xc] sm:$0x1]  ;;  %v19_v9 = vld [vmem:[%s721_s0 + $0x10] sm:$0x1]  ;;  %490 = vmatprep.subr.mxu0 %v544_v3  ;;  %497 = vmatprep.subr.mxu1 %v544_v3 }
   0x4   :  { %v20_v10 = vld [vmem:[%s721_s0 + $0x14] sm:$0x1]  ;;  %v34_v11 = vrot.slane %v16_v6, 7  ;;  %v37_v12 = vrot.slane %v17_v7, 6  ;;  %v40_v13 = vrot.slane %v18_v8, 5  ;;  %491 = vmatpush3.msra.mxu0 %v21_v2  ;;  %492 = vmatprep.mubr.msk.f32.mxu0 %vm545_vm2, %v544_v3  ;;  %v43_v14 = vrot.slane %v19_v9, 4 }
   0x5   :  { %v46_v15 = vrot.slane %v20_v10, 3  ;;  %v124_v16 = vld [vmem:[%s721_s0 + $0x1] sm:$0x1]  ;;  %498 = vmatpush3.msra.mxu1 %v464_v4  ;;  %499 = vmatprep.mubr.msk.f32.mxu1 %vm545_vm2, %v544_v3  ;;  %v125_v18 = vld [vmem:[%s721_s0 + $0x5] sm:$0x1]  ;;  %v469_v28 = vld [vmem:[%s722_s1 + $0x28] sm:$0xff] }
   0x6   :  { %v36_v17 = vsel %vm35_vm0, %v34_v11, %v15_v5  ;;  %v126_v19 = vld [vmem:[%s721_s0 + $0x9] sm:$0x1]  ;;  %502 = vmatprep.subr.mxu0 %v544_v3  ;;  %v127_v21 = vld [vmem:[%s721_s0 + $0xd] sm:$0x1]  ;;  %v128_v22 = vld [vmem:[%s721_s0 + $0x11] sm:$0x1]  ;;  %509 = vmatprep.subr.mxu1 %v544_v3 }
   0x7   :  { %v39_v20 = vsel %vm38_vm1, %v37_v12, %v36_v17  ;;  %v129_v23 = vld [vmem:[%s721_s0 + $0x15] sm:$0x1]  ;;  %v144_v25 = vrot.slane %v125_v18, 7  ;;  %v146_v26 = vrot.slane %v126_v19, 6  ;;  %v148_v27 = vrot.slane %v127_v21, 5  ;;  %v473_v40 = vld [vmem:[%s722_s1 + $0x38] sm:$0xff] }
   0x8   :  { %v42_v24 = vsel %vm41_vm3, %v40_v13, %v39_v20  ;;  %v150_v30 = vrot.slane %v128_v22, 4  ;;  %v152_v31 = vrot.slane %v129_v23, 3  ;;  %v232_v32 = vld [vmem:[%s721_s0 + $0x2] sm:$0x1]  ;;  %v233_v33 = vld [vmem:[%s721_s0 + $0x6] sm:$0x1] }
   0x9   :  { %v45_v29 = vsel %vm44_vm4, %v43_v14, %v42_v24  ;;  %v145_v35 = vsel %vm35_vm0, %v144_v25, %v124_v16  ;;  %v234_v36 = vld [vmem:[%s721_s0 + $0xa] sm:$0x1]  ;;  %v235_v37 = vld [vmem:[%s721_s0 + $0xe] sm:$0x1]  ;;  %v236_v38 = vld [vmem:[%s721_s0 + $0x12] sm:$0x1] }
   0xa   :  { %v48_v34 = vsel %vm47_vm5, %v46_v15, %v45_v29  ;;  %v147_v39 = vsel %vm38_vm1, %v146_v26, %v145_v35  ;;  %v468_v41 = vld [vmem:[%s722_s1 + $0x20] sm:$0xff]  ;;  %v237_v42 = vld [vmem:[%s721_s0 + $0x16] sm:$0x1]  ;;  %v252_v43 = vrot.slane %v233_v33, 7  ;;  %v254_v44 = vrot.slane %v234_v36, 6 }
   0xb   :  { %493 = vmatmul.mubr.msk.f32.vlgmr.msra.gmra.mxu0 %vm49_vm6, %v48_v34  ;;  %v256_v45 = vrot.slane %v235_v37, 5  ;;  %v149_v46 = vsel %vm41_vm3, %v148_v27, %v147_v39  ;;  %v258_v47 = vrot.slane %v236_v38, 4  ;;  %v260_v48 = vrot.slane %v237_v42, 3  ;;  %v340_v49 = vld [vmem:[%s721_s0 + $0x3] sm:$0x1]  ;;  %v472_v61 = vld [vmem:[%s722_s1 + $0x30] sm:$0xff] }
   0xc   :  { %503 = vmatpush3.msra.mxu0 %v469_v28  ;;  %506 = vmatprep.mubr.msk.f32.mxu0 %vm545_vm2, %v544_v3  ;;  %v341_v50 = vld [vmem:[%s721_s0 + $0x7] sm:$0x1]  ;;  %v151_v51 = vsel %vm44_vm4, %v150_v30, %v149_v46  ;;  %v253_v52 = vsel %vm35_vm0, %v252_v43, %v232_v32  ;;  %v342_v53 = vld [vmem:[%s721_s0 + $0xb] sm:$0x1]  ;;  %v343_v54 = vld [vmem:[%s721_s0 + $0xf] sm:$0x1] }
   0xd   :  { %504 = vmatprep.subr.mxu0 %v544_v3  ;;  %v344_v55 = vld [vmem:[%s721_s0 + $0x13] sm:$0x1]  ;;  %v153_v56 = vsel %vm47_vm5, %v152_v31, %v151_v51  ;;  %v255_v57 = vsel %vm38_vm1, %v254_v44, %v253_v52  ;;  %v345_v58 = vld [vmem:[%s721_s0 + $0x17] sm:$0x1]  ;;  %v360_v59 = vrot.slane %v341_v50, 7  ;;  %v362_v60 = vrot.slane %v342_v53, 6 }
   0xe   :  { %505 = vmatpush3.msra.mxu0 %v468_v41  ;;  %500 = vmatmul.mubr.msk.f32.vlgmr.msra.gmra.mxu1 %vm49_vm6, %v153_v56  ;;  %v257_v62 = vsel %vm41_vm3, %v256_v45, %v255_v57  ;;  %v364_v63 = vrot.slane %v343_v54, 5  ;;  %v366_v0 = vrot.slane %v344_v55, 4 }
   0xf   :  { %8 = vsyncpa [#allocation3], 0  ;;  %510 = vmatpush3.msra.mxu1 %v473_v40  ;;  %513 = vmatprep.mubr.msk.f32.mxu1 %vm545_vm2, %v544_v3  ;;  %v259_v1 = vsel %vm44_vm4, %v258_v47, %v257_v62  ;;  %v361_v2 = vsel %vm35_vm0, %v360_v59, %v340_v49  ;;  %v368_v4 = vrot.slane %v345_v58, 3  ;;  %v462_v10 = vld [vmem:[%s723_s2] ss:$0 sm:$0xff]  ;;  %vm122_vm7 = vcmask 62464  }
  0x10   :  { %511 = vmatprep.subr.mxu1 %v544_v3  ;;  %v261_v5 = vsel %vm47_vm5, %v260_v48, %v259_v1  ;;  %v363_v6 = vsel %vm38_vm1, %v362_v60, %v361_v2  ;;  %v466_v12 = vld [vmem:[%s723_s2 + $0x1] ss:$0 sm:$0xff]  ;;  %v470_v16 = vld [vmem:[%s723_s2 + $0x2] ss:$0 sm:$0xff]  ;;  %s546_s26 = smov 8   ;;  %s547_s29 = smov 16  }
  0x11   :  { %512 = vmatpush3.msra.mxu1 %v472_v61  ;;  %507 = vmatmul.mubr.msk.f32.vlgmr.msra.gmra.mxu0 %vm49_vm6, %v261_v5  ;;  %v365_v7 = vsel %vm41_vm3, %v364_v63, %v363_v6  ;;  %v474_v20 = vld [vmem:[%s723_s2 + $0x3] ss:$0 sm:$0xff]  ;;  %s548_s30 = smov 24   ;;  %vm230_vm8 = vcmask 128064   ;;  %vm338_vm9 = vcmask 193664   ;;  %s549_s4 = smov [#allocation2]  }
  0x12   :  { %v367_v8 = vsel %vm44_vm4, %v366_v0, %v365_v7  ;;  %s454_s5 = sshll.u32 %s549_s4, 4  ;;  %vm446_vm10 = vcmask 259264   ;;  %s455_s5 = int_to_ptr.vmem [resolvable:$true] %s454_s5 }
  0x13   :  { %v369_v9 = vsel %vm47_vm5, %v368_v4, %v367_v8  ;;  %s522_s2 = scalar_lea.vmem %s455_s5, 128  ;;  %p527_p1 = scmp.lt.s32.totalorder %s455_s5, %s455_s5 }
  0x14   :  { %514 = vmatmul.mubr.msk.f32.vlgmr.msra.gmra.mxu1 %vm49_vm6, %v369_v9  ;;  %p523_p0 = scmp.ne.s32.totalorder %s455_s5, %s522_s2  ;;  %p528_p2 = scmp.lt.s32.totalorder %s522_s2, %s522_s2 }
  0x16   :  { %p529_p3 = por %p528_p2, %p527_p1 }
  0x18   :  { %p530_p4 = pnand %p529_p3, %p523_p0 }
  0xcb   :  { %v118_v3 = vpop.f32.mrf.mxu0 }
  0xcc   :  { %v119_v11 = vadd.f32 %v462_v10, %v118_v3 }
  0xcd   :  { %v494_v13 = vpop.f32.mrf.mxu0 }
  0xce   :  { %123 = vst.msk [vmem:[#allocation2] sm:$0x3f] %vm122_vm7, %v119_v11  ;;  %v222_v14 = vpop.f32.mrf.mxu1 }
  0xcf   :  { %v223_v15 = vadd.f32 %v466_v12, %v222_v14 }
  0xd0   :  { %v501_v17 = vpop.f32.mrf.mxu1 }
  0xd1   :  { %227 = vrot.lane.b32.xlu0 %v223_v15, %s546_s26  ;;  %v330_v18 = vpop.f32.mrf.mxu0 }
  0xd2   :  { %v331_v19 = vadd.f32 %v470_v16, %v330_v18 }
  0xd3   :  { %v508_v21 = vpop.f32.mrf.mxu0 }
  0xd4   :  { %v438_v22 = vpop.f32.mrf.mxu1 }
  0xd5   :  { %v439_v23 = vadd.f32 %v474_v20, %v438_v22  ;;  %335 = vrot.lane.b32.xlu0 %v331_v19, %s547_s29 }
  0xd6   :  { %v515_v24 = vpop.f32.mrf.mxu1 }
  0xd7   :  { %443 = vrot.lane.b32.xlu1 %v439_v23, %s548_s30 }
 0x143   :  { %v228_v25 = vpop.permute.xlu0 %227 }
 0x144   :  { %231 = vst.msk [vmem:[#allocation2] sm:$0x3f] %vm230_vm8, %v228_v25 }
 0x147   :  { %v336_v26 = vpop.permute.xlu0 %335 }
 0x148   :  { %339 = vst.msk [vmem:[#allocation2] sm:$0x3f] %vm338_vm9, %v336_v26 }
 0x149   :  { %v444_v27 = vpop.permute.xlu1 %443 }
 0x14a   :  { %447 = vst.msk [vmem:[#allocation2] sm:$0x3f] %vm446_vm10, %v444_v27 }
 0x14b   :  { %533 = shalt.err (!%p530_p4)
}
 0x14c   :  { %457 = dma.vmem_to_hbm [thread:$0]  %s455_s5, 128, %s724_s3, [#allocation3]  }
 0x14d   :  { %542 = dma.done.wait [#allocation3], 128  }
 0x14e   :  { %543 = vsyncadd [#allocation3], 4294967168 }
 0x14f   :  { %461 = vsyncpa [#allocation3], 1 }

</bundles_post_ra>
